<compile_context>
chip_gen: v7x
topology: tpu7x:2x2x1
jax: 0.10.0
libtpu: 0.0.40
codegen_flags: <defaults>
</compile_context>

<pallas_src>
import math
import functools

import jax
import jax.numpy as jnp
import numpy as np
from jax.experimental import pallas as pl
from jax.experimental.pallas import tpu as pltpu


def _round_up(x, m):
    return ((x + m - 1) // m) * m


def _padded_bytes(shape, bytes_per_elem=4):
    """f32/i32 VMEM footprint of an array: last dim padded to 128 lanes,
    second-to-last to 8 sublanes, leading dims multiply."""
    shape = tuple(int(s) for s in shape)
    if len(shape) == 1:
        shape = (1,) + shape
    lead = 1
    for s in shape[:-2]:
        lead *= s
    return lead * _round_up(shape[-2], 8) * _round_up(shape[-1], 128) * bytes_per_elem


def _vmem_budget():
    """(tile budget bytes, vmem_limit_bytes) derived from this chip's VMEM.

    v5e/v6e: 128 MiB physical -> ~83 MiB tile budget; v7x: 64 MiB -> ~42 MiB.
    Falls back to a v7x-sized assumption if the query is unavailable.
    """
    try:
        cap = int(pltpu.get_tpu_info().vmem_capacity_bytes)
    except Exception:
        cap = 64 << 20
    return int(cap * 0.65), int(cap * 0.90)


# ----------------------------------------------------------------------------
# Linear projection kernel (create_k_q):  y = x @ W_t + b   (W_t pre-transposed)
# ----------------------------------------------------------------------------
def _linear_kernel(x_ref, wt_ref, b_ref, o_ref):
    y = jnp.dot(x_ref[...], wt_ref[...], preferred_element_type=jnp.float32)
    o_ref[...] = (y + b_ref[...]).astype(o_ref.dtype)


def _pick_tm(N, d_in, d_out, budget_bytes, cap=4096):
    if N < 8:
        return N
    cap = min(cap, _round_up(N, 8))
    tm = 8
    while tm * 2 <= cap:
        nxt = tm * 2
        step = (2 * (_padded_bytes((nxt, d_in)) + _padded_bytes((nxt, d_out)))
                + 2 * _padded_bytes((d_in, d_out)) + 2 * _padded_bytes((1, d_out)))
        if step > budget_bytes:
            break
        tm = nxt
    return tm


def pallas_linear(x, wt, b2):
    """x: (N, d_in), wt: (d_in, d_out) pre-transposed nn.Linear weight,
    b2: (1, d_out) -> (N, d_out)."""
    N, d_in = x.shape
    d_out = wt.shape[1]
    budget, vmem_limit = _vmem_budget()
    tm = _pick_tm(N, d_in, d_out, budget)
    return pl.pallas_call(
        _linear_kernel,
        out_shape=jax.ShapeDtypeStruct((N, d_out), x.dtype),
        grid=(pl.cdiv(N, tm),),
        in_specs=[
            pl.BlockSpec((tm, d_in), lambda i: (i, 0)),      # row-tiled, double-buffered
            pl.BlockSpec((d_in, d_out), lambda i: (0, 0)),   # full weight, resident
            pl.BlockSpec((1, d_out), lambda i: (0, 0)),
        ],
        out_specs=pl.BlockSpec((tm, d_out), lambda i: (i, 0)),
        compiler_params=pltpu.CompilerParams(
            dimension_semantics=("parallel",), vmem_limit_bytes=vmem_limit),
    )(x, wt, b2)


# ----------------------------------------------------------------------------
# Shared softmax helper (EUP approx reciprocal + one Newton refinement)
# ----------------------------------------------------------------------------
def _softmax_rows(scores):
    s_max = jnp.max(scores, axis=-1, keepdims=True)
    e = jnp.exp(scores - s_max)
    denom = jnp.sum(e, axis=-1, keepdims=True)
    inv = pl.reciprocal(denom, approx=True)      # EUP slot (otherwise idle)
    inv = inv * (2.0 - denom * inv)              # Newton step -> f32-accurate p_attn
    return e * inv


def _pick_tb(B, step_bytes_fn, budget_bytes, cap=1024):
    """Largest multiple-of-8 batch tile whose padded, double-buffered per-step
    footprint fits the budget; guarantees >=2 grid steps when B > 8 so v7x can
    shard the parallel axis across its 2 TensorCores."""
    if B < 8:
        return B
    cap = min(cap, _round_up(B, 8))
    tb = 8
    while tb * 2 <= cap and step_bytes_fn(tb * 2) <= budget_bytes:
        tb *= 2
    if B > 8 and tb >= B:
        tb = min(tb, _round_up((B + 1) // 2, 8))
    return tb


# ----------------------------------------------------------------------------
# Module-faithful attention kernel (forward(query, key, value, mask))
# ----------------------------------------------------------------------------
def _attn_kernel(q_ref, k_ref, v_ref, *rest, scale, has_mask):
    if has_mask:
        m_ref, out_ref, p_ref = rest
    else:
        out_ref, p_ref = rest
    q = q_ref[...] * scale                       # (TB, d_k), 1/sqrt(d_k) folded in
    k = k_ref[...]                               # (TB, S, d_k)
    v = v_ref[...]                               # (TB, S, d_v)
    # scores[b,s] = sum_d q[b,d] * k[b,s,d]
    scores = jnp.sum(q[:, None, :] * k, axis=-1)                 # (TB, S)
    if has_mask:
        scores = jnp.where(m_ref[...] == 0, jnp.float32(-1e9), scores)
    p = _softmax_rows(scores)
    ctx = jnp.sum(p[:, :, None] * v, axis=1)                     # (TB, d_v)
    out_ref[...] = ctx.astype(out_ref.dtype)
    p_ref[...] = p.astype(p_ref.dtype)


def cross_attention_forward(query, key, value, mask=None):
    """Pallas version of CrossAttentionModule.forward (dropout=None).

    query: (B, d_k), key: (B, S, d_k), value: (B, S, d_v),
    mask: (B,1,S)/(B,S) or None.
    Returns (context (B,1,d_v), new_p_attn (B,S,1)).
    """
    # TODO(synk): dropout on p_attn not implemented (forward used with dropout=None).
    B, d_k = query.shape
    _, S, _ = key.shape
    d_v = value.shape[-1]
    has_mask = mask is not None
    budget, vmem_limit = _vmem_budget()

    def step_bytes(tb):
        n = 2 * (_padded_bytes((tb, d_k)) + _padded_bytes((tb, S, d_k))
                 + _padded_bytes((tb, S, d_v)) + _padded_bytes((tb, d_v))
                 + _padded_bytes((tb, S)))
        if has_mask:
            n += 2 * _padded_bytes((tb, S))
        # materialized broadcast temporaries + softmax temps
        n += _padded_bytes((tb, S, d_k)) + _padded_bytes((tb, S, d_v))
        n += 4 * _padded_bytes((tb, S))
        return n

    TB = _pick_tb(B, step_bytes, budget)

    arrays = [query, key, value]
    in_specs = [pl.BlockSpec((TB, d_k), lambda b: (b, 0)),
                pl.BlockSpec((TB, S, d_k), lambda b: (b, 0, 0)),
                pl.BlockSpec((TB, S, d_v), lambda b: (b, 0, 0))]
    if has_mask:
        arrays.append(mask.reshape(B, S).astype(jnp.int32))
        in_specs.append(pl.BlockSpec((TB, S), lambda b: (b, 0)))

    kernel = functools.partial(_attn_kernel, scale=1.0 / math.sqrt(d_k), has_mask=has_mask)
    out, p_attn = pl.pallas_call(
        kernel,
        out_shape=(jax.ShapeDtypeStruct((B, d_v), query.dtype),
                   jax.ShapeDtypeStruct((B, S), jnp.float32)),
        grid=(pl.cdiv(B, TB),),
        in_specs=in_specs,
        out_specs=(pl.BlockSpec((TB, d_v), lambda b: (b, 0)),
                   pl.BlockSpec((TB, S), lambda b: (b, 0))),
        compiler_params=pltpu.CompilerParams(
            dimension_semantics=("parallel",), vmem_limit_bytes=vmem_limit),
    )(*arrays)
    return out.reshape(B, 1, d_v), p_attn.reshape(B, S, 1)


# ----------------------------------------------------------------------------
# Fused attention kernel: text_key projection folded into the attention.
#   scores = (q/sqrt(dk)).(x W^T + b) = ((q/sqrt(dk)) @ W).x + (q/sqrt(dk)).b
# so the projected key never touches HBM (or even VMEM).
# ----------------------------------------------------------------------------
def _fused_attn_kernel(q_ref, w_ref, b_ref, x_ref, v_ref, *rest, scale, has_mask):
    if has_mask:
        m_ref, out_ref, p_ref = rest
    else:
        out_ref, p_ref = rest
    qs = q_ref[...] * scale                                           # (TB, att)
    qw = jnp.dot(qs, w_ref[...], preferred_element_type=jnp.float32)  # (TB, T)  MXU
    qb = jnp.sum(qs * b_ref[...], axis=-1, keepdims=True)             # (TB, 1)
    x = x_ref[...]                                                    # (TB, S, T)
    scores = jnp.sum(qw[:, None, :] * x, axis=-1) + qb                # (TB, S)
    if has_mask:
        scores = jnp.where(m_ref[...] == 0, jnp.float32(-1e9), scores)
    p = _softmax_rows(scores)
    ctx = jnp.sum(p[:, :, None] * v_ref[...], axis=1)                 # (TB, d_v)
    out_ref[...] = ctx.astype(out_ref.dtype)
    p_ref[...] = p.astype(p_ref.dtype)


def cross_attention_fused(query, enc_text, w_text, b_text, value, mask=None):
    """forward() with key = text_key(enc_text) computed inside the kernel.

    query: (B, att), enc_text: (B, S, T), w_text: (att, T) [nn.Linear layout],
    b_text: (1, att), value: (B, S, d_v), mask: (B,1,S)/(B,S) or None.
    Returns (context (B,1,d_v), new_p_attn (B,S,1)).
    """
    B, att = query.shape
    _, S, T = enc_text.shape
    d_v = value.shape[-1]
    has_mask = mask is not None
    budget, vmem_limit = _vmem_budget()

    def step_bytes(tb):
        n = 2 * (_padded_bytes((tb, att)) + _padded_bytes((tb, S, T))
                 + _padded_bytes((tb, S, d_v)) + _padded_bytes((tb, d_v))
                 + _padded_bytes((tb, S)))
        if has_mask:
            n += 2 * _padded_bytes((tb, S))
        n += 2 * (_padded_bytes((att, T)) + _padded_bytes((1, att)))     # resident weights
        n += _padded_bytes((tb, S, T)) + _padded_bytes((tb, S, d_v))     # broadcast temps
        n += _padded_bytes((tb, T)) + 4 * _padded_bytes((tb, S))
        return n

    TB = _pick_tb(B, step_bytes, budget)

    arrays = [query, w_text, b_text, enc_text, value]
    in_specs = [pl.BlockSpec((TB, att), lambda b: (b, 0)),
                pl.BlockSpec((att, T), lambda b: (0, 0)),
                pl.BlockSpec((1, att), lambda b: (0, 0)),
                pl.BlockSpec((TB, S, T), lambda b: (b, 0, 0)),
                pl.BlockSpec((TB, S, d_v), lambda b: (b, 0, 0))]
    if has_mask:
        arrays.append(mask.reshape(B, S).astype(jnp.int32))
        in_specs.append(pl.BlockSpec((TB, S), lambda b: (b, 0)))

    kernel = functools.partial(_fused_attn_kernel, scale=1.0 / math.sqrt(att),
                               has_mask=has_mask)
    out, p_attn = pl.pallas_call(
        kernel,
        out_shape=(jax.ShapeDtypeStruct((B, d_v), query.dtype),
                   jax.ShapeDtypeStruct((B, S), jnp.float32)),
        grid=(pl.cdiv(B, TB),),
        in_specs=in_specs,
        out_specs=(pl.BlockSpec((TB, d_v), lambda b: (b, 0)),
                   pl.BlockSpec((TB, S), lambda b: (b, 0))),
        compiler_params=pltpu.CompilerParams(
            dimension_semantics=("parallel",), vmem_limit_bytes=vmem_limit),
    )(*arrays)
    return out.reshape(B, 1, d_v), p_attn.reshape(B, S, 1)


# ----------------------------------------------------------------------------
# Parameter setup (mirrors nn.Linear init; weights stored pre-transposed too)
# ----------------------------------------------------------------------------
def init_params(key, text_enc_dim, img_enc_dim, comb_enc_dim, att_dim):
    def linear_init(k, d_out, d_in):
        kw, kb = jax.random.split(k)
        bound = 1.0 / math.sqrt(d_in)
        w = jax.random.uniform(kw, (d_out, d_in), jnp.float32, -bound, bound)
        b = jax.random.uniform(kb, (d_out,), jnp.float32, -bound, bound)
        return {"w": w, "wt": w.T, "b": b.reshape(1, d_out)}

    k1, k2, k3 = jax.random.split(key, 3)
    return {"img_key": linear_init(k1, att_dim, img_enc_dim),
            "text_key": linear_init(k2, att_dim, text_enc_dim),
            "comb_query": linear_init(k3, att_dim, comb_enc_dim)}


def create_k_q(params, enc_img, enc_text, combined_enc):
    B, S_t, _ = enc_text.shape
    _, S_i, _ = enc_img.shape
    att = params["text_key"]["wt"].shape[1]
    text_k = pallas_linear(enc_text.reshape(B * S_t, -1),
                           params["text_key"]["wt"], params["text_key"]["b"]).reshape(B, S_t, att)
    img_k = pallas_linear(enc_img.reshape(B * S_i, -1),
                          params["img_key"]["wt"], params["img_key"]["b"]).reshape(B, S_i, att)
    comb_q = pallas_linear(combined_enc, params["comb_query"]["wt"], params["comb_query"]["b"])
    return text_k, img_k, comb_q


# ----------------------------------------------------------------------------
# Pure-JAX reference for validation
# ----------------------------------------------------------------------------
def reference_forward(query, key, value, mask):
    d_k = query.shape[-1]
    q = query[:, None, :]
    scores = jnp.matmul(q, jnp.swapaxes(key, -2, -1)) / math.sqrt(d_k)
    if mask is not None:
        scores = jnp.where(mask == 0, -1e9, scores)
    p = jax.nn.softmax(scores, axis=-1)
    return jnp.matmul(p, value), jnp.swapaxes(p, 1, 2)


if __name__ == "__main__":
    B, S = 2, 8
    text_enc_dim, img_enc_dim, comb_enc_dim, att_dim = 48, 40, 64, 32

    root = jax.random.PRNGKey(0)
    kp, k1, k2, k3 = jax.random.split(root, 4)
    params = init_params(kp, text_enc_dim, img_enc_dim, comb_enc_dim, att_dim)

    enc_text = jax.random.normal(k1, (B, S, text_enc_dim), jnp.float32)
    enc_img = jax.random.normal(k2, (B, S, img_enc_dim), jnp.float32)
    combined_enc = jax.random.normal(k3, (B, comb_enc_dim), jnp.float32)
    mask = jnp.ones((B, 1, S), jnp.int32).at[1, 0, -1].set(0)   # mask out last pos of batch 1

    # create_k_q (module API): Pallas linear projections
    text_k, img_k, comb_q = create_k_q(params, enc_img, enc_text, combined_enc)
    text_k, img_k, comb_q = jax.block_until_ready((text_k, img_k, comb_q))

    ref_text_k = jnp.matmul(enc_text, params["text_key"]["w"].T) + params["text_key"]["b"][0]
    np.testing.assert_allclose(np.asarray(text_k), np.asarray(ref_text_k), rtol=1e-4, atol=1e-4)

    # module-faithful forward: value = raw text encoding, key = projected text
    out, new_p_attn = cross_attention_forward(comb_q, text_k, enc_text, mask)
    out, new_p_attn = jax.block_until_ready((out, new_p_attn))

    ref_out, ref_p = reference_forward(comb_q, ref_text_k, enc_text, mask)
    np.testing.assert_allclose(np.asarray(out), np.asarray(ref_out), rtol=1e-3, atol=1e-3)
    np.testing.assert_allclose(np.asarray(new_p_attn), np.asarray(ref_p), rtol=1e-3, atol=1e-3)
    assert out.shape == (B, 1, text_enc_dim) and new_p_attn.shape == (B, S, 1)

    # fused forward: text_key projection folded into the attention kernel
    f_out, f_p = cross_attention_fused(comb_q, enc_text, params["text_key"]["w"],
                                       params["text_key"]["b"], enc_text, mask)
    f_out, f_p = jax.block_until_ready((f_out, f_p))
    np.testing.assert_allclose(np.asarray(f_out), np.asarray(ref_out), rtol=1e-3, atol=1e-3)
    np.testing.assert_allclose(np.asarray(f_p), np.asarray(ref_p), rtol=1e-3, atol=1e-3)

    # no-mask kernel variant (mask stream and compare/select elided)
    nm_out, nm_p = cross_attention_forward(comb_q, text_k, enc_text, None)
    nm_out, nm_p = jax.block_until_ready((nm_out, nm_p))
    ref_nm_out, ref_nm_p = reference_forward(comb_q, ref_text_k, enc_text, None)
    np.testing.assert_allclose(np.asarray(nm_out), np.asarray(ref_nm_out), rtol=1e-3, atol=1e-3)

    print("KERNEL_OK")
</pallas_src>

<mosaic_0001>
module attributes {stable_mosaic.version = 11 : i64} {
  func.func @_linear_kernel(%arg0: i32, %arg1: memref<16x48xf32, #tpu.memory_space<vmem>>, %arg2: memref<48x32xf32, #tpu.memory_space<vmem>>, %arg3: memref<1x32xf32, #tpu.memory_space<vmem>>, %arg4: memref<16x32xf32, #tpu.memory_space<vmem>>) attributes {dimension_semantics = [#tpu.dimension_semantics<parallel>], iteration_bounds = array<i64: 1>, scalar_prefetch = 0 : i64, scratch_operands = 0 : i64, tpu.core_type = #tpu.core_type<tc>, window_params = [{transform_indices = @transform_0, window_bounds = array<i64: 16, 48>}, {pipeline_mode = #tpu.pipeline_mode<synchronous>, transform_indices = @transform_1, window_bounds = array<i64: 48, 32>}, {pipeline_mode = #tpu.pipeline_mode<synchronous>, transform_indices = @transform_2, window_bounds = array<i64: 1, 32>}, {transform_indices = @transform_3, window_bounds = array<i64: 16, 32>}]} {
    %c0 = arith.constant 0 : index
    %c0_0 = arith.constant 0 : index
    %0 = vector.load %arg1[%c0, %c0_0] : memref<16x48xf32, #tpu.memory_space<vmem>>, vector<16x48xf32>
    %c0_1 = arith.constant 0 : index
    %c0_2 = arith.constant 0 : index
    %1 = vector.load %arg2[%c0_1, %c0_2] : memref<48x32xf32, #tpu.memory_space<vmem>>, vector<48x32xf32>
    %cst = arith.constant dense<0.000000e+00> : vector<16x32xf32>
    %2 = tpu.matmul %0, %1, %cst {dimension_numbers = #tpu.dot_dimension_numbers<[1], [0], [0], [1], [0, 0, 1, 1], [], []>} : vector<16x48xf32>, vector<48x32xf32>, vector<16x32xf32> -> vector<16x32xf32>
    %c0_3 = arith.constant 0 : index
    %c0_4 = arith.constant 0 : index
    %3 = vector.load %arg3[%c0_3, %c0_4] : memref<1x32xf32, #tpu.memory_space<vmem>>, vector<1x32xf32>
    %4 = vector.broadcast %3 : vector<1x32xf32> to vector<16x32xf32>
    %5 = arith.addf %2, %4 : vector<16x32xf32>
    %c0_5 = arith.constant 0 : index
    %c0_6 = arith.constant 0 : index
    %6 = vector.load %arg4[%c0_5, %c0_6] : memref<16x32xf32, #tpu.memory_space<vmem>>, vector<16x32xf32>
    tpu.vector_store %arg4[%c0_5, %c0_6], %5 {strides = array<i32>} : memref<16x32xf32, #tpu.memory_space<vmem>>, vector<16x32xf32>,
    return
  }
  func.func @transform_0(%arg0: i32) -> (i32, i32) {
    %c0_i32 = arith.constant 0 : i32
    %c0_i32_0 = arith.constant 0 : i32
    return %arg0, %c0_i32 : i32, i32
  }
  func.func @transform_1(%arg0: i32) -> (i32, i32) {
    %c0_i32 = arith.constant 0 : i32
    %c0_i32_0 = arith.constant 0 : i32
    %c0_i32_1 = arith.constant 0 : i32
    return %c0_i32, %c0_i32_0 : i32, i32
  }
  func.func @transform_2(%arg0: i32) -> (i32, i32) {
    %c0_i32 = arith.constant 0 : i32
    %c0_i32_0 = arith.constant 0 : i32
    %c0_i32_1 = arith.constant 0 : i32
    return %c0_i32, %c0_i32_0 : i32, i32
  }
  func.func @transform_3(%arg0: i32) -> (i32, i32) {
    %c0_i32 = arith.constant 0 : i32
    %c0_i32_0 = arith.constant 0 : i32
    return %arg0, %c0_i32 : i32, i32
  }
}

</mosaic_0001>

<bundles_post_ra>
// kernel: tpu_custom_call.1
= control target key start
LH: loop header
LB: loop body
LE: loop exit
PB: predicated region body
PF: predicated region fallthrough
CT: control target
= control target key end

     0   :  { %vm30_vm0 = vcmask 392192   ;;  %s260_s0 = inlined_call_operand.vmem [shape: f32[16,48], index: 0, kind: input, shape index: {}]   ;;  %s261_s1 = inlined_call_operand.vmem [shape: f32[48,32], index: 1, kind: input, shape index: {}]   ;;  %s262_s2 = inlined_call_operand.vmem [shape: f32[1,32], index: 2, kind: input, shape index: {}]   ;;  %s263_s3 = inlined_call_operand.hbm [shape: f32[16,32], index: 3, kind: output, shape index: {}]  }
   0x1   :  { %v17_v0 = vld [vmem:[%s261_s1] sm:$0xff]  ;;  %v18_v1 = vld [vmem:[%s261_s1 + $0x8] sm:$0xff]  ;;  %v19_v2 = vld [vmem:[%s261_s1 + $0x10] sm:$0xff] }
   0x2   :  { %v157_v3 = vpack.c.bf16 %v18_v1, %v17_v0  ;;  %v20_v4 = vld [vmem:[%s261_s1 + $0x18] sm:$0xff]  ;;  %v21_v5 = vld [vmem:[%s261_s1 + $0x20] sm:$0xff]  ;;  %v22_v7 = vld [vmem:[%s261_s1 + $0x28] sm:$0xff] }
   0x3   :  { %v161_v6 = vpack.c.bf16 %v20_v4, %v19_v2  ;;  %v15_v8 = vld [vmem:[%s260_s0] sm:$0xff] }
   0x4   :  { %8 = vsyncpa [#allocation3], 0  ;;  %158 = vmatprep.subr.bf16.mxu0 %v157_v3  ;;  %154 = vmatprep.mubr.msk.f32.mxu0 %vm30_vm0, %v15_v8  ;;  %v165_v9 = vpack.c.bf16 %v22_v7, %v21_v5  ;;  %v16_v10 = vld [vmem:[%s260_s0 + $0x8] sm:$0xff]  ;;  %v131_v11 = vld [vmem:[%s262_s2] ss:$0 sm:$0xff]  ;;  %s196_s29 = smov [#allocation2]  }
   0x5   :  { %160 = vmatpush3.bf16.msra.mxu0 %v157_v3  ;;  %s120_s30 = sshll.u32 %s196_s29, 4  ;;  %vm112_vm1 = vcmask 261120   ;;  %s121_s30 = int_to_ptr.vmem [resolvable:$true] %s120_s30 }
   0x6   :  { %162 = vmatprep.subr.bf16.mxu0 %v161_v6  ;;  %s172_s4 = scalar_lea.vmem %s121_s30, 256  ;;  %p177_p1 = scmp.lt.s32.totalorder %s121_s30, %s121_s30 }
   0x7   :  { %p173_p0 = scmp.ne.s32.totalorder %s121_s30, %s172_s4  ;;  %p178_p2 = scmp.lt.s32.totalorder %s172_s4, %s172_s4 }
   0x9   :  { %164 = vmatpush3.bf16.msra.mxu0 %v161_v6  ;;  %p179_p3 = por %p178_p2, %p177_p1 }
   0xa   :  { %166 = vmatprep.subr.bf16.mxu0 %v165_v9 }
   0xb   :  { %p180_p4 = pnand %p179_p3, %p173_p0 }
   0xd   :  { %168 = vmatpush3.bf16.msra.mxu0 %v165_v9 }
  0x10   :  { %155 = vmatmul.mubr.msk.f32.vlgmr.msra.gmra.mrb[0].mxu0 %vm30_vm0, %v16_v10 }
  0xe3   :  { %v156_v12 = vpop.f32.mrb[0].mxu0 }
  0xe4   :  { %v109_v13 = vadd.f32 %v156_v12, %v131_v11  ;;  %v103_v14 = vpop.f32.mrb[1].mxu0 }
  0xe5   :  { %v104_v15 = vadd.f32 %v131_v11, %v103_v14 }
  0xe6   :  { %114 = vst.msk [vmem:[#allocation2 + $0x8] sm:$0xff] %vm112_vm1, %v109_v13 }
  0xe7   :  { %113 = vst.msk [vmem:[#allocation2] sm:$0xff] %vm112_vm1, %v104_v15 }
  0xe8   :  { %183 = shalt.err (!%p180_p4)
}
  0xe9   :  { %s184_s2 = scalar_lea.hbm %s263_s3, 256 }
  0xea   :  { %p185_p5 = scmp.ne.s32.totalorder %s263_s3, %s184_s2  ;;  %p188_p6 = scmp.lt.u32.totalorder %s184_s2, %s263_s3 }
  0xec   :  { %p190_p7 = pnand %p188_p6, %p185_p5 }
  0xee   :  { %193 = shalt.err (!%p190_p7)
}
  0xef   :  { %s197_s10 = smov 128   ;;  %s198_s11 = smov 8  }
  0xf0   :  { %126 = dma.vmem_to_hbm [thread:$0]  %s121_s30, 256, %s263_s3, [#allocation3], %s197_s10, %s197_s10, %s198_s11  }
  0xf1   :  { %194 = dma.done.wait [#allocation3], 256  }
  0xf2   :  { %195 = vsyncadd [#allocation3], 4294967040 }
  0xf3   :  { %130 = vsyncpa [#allocation3], 1 }

</bundles_post_ra>
